<compile_context>
chip_gen: v6e
topology: v6e:2x2x1
jax: 0.10.0
libtpu: 0.0.40
codegen_flags: <defaults>
</compile_context>

<pallas_src>
import jax
import jax.numpy as jnp
from jax.experimental import pallas as pl
from jax.experimental.pallas import tpu as pltpu

N_OBS = 12
IN_DIM = N_OBS + 1          # 13
HIDDEN = 256                # rnn_hidden_dim
N_ACTIONS = 8 * 3 + 1       # 25

IN_PAD = 128                # lane-dense padded input width
OUT_PAD = 128               # lane-dense padded q width


def rnn_kernel(x_ref, h0_ref,
               w1_ref, b1_ref,
               wih_ref, whh_ref, brz_ref, bin_ref, bhn_ref,
               w2_ref, b2_ref,
               q_ref, hn_ref,
               h_acc):
    t = pl.program_id(0)

    @pl.when(t == 0)
    def _():
        h_acc[...] = h0_ref[...]

    x = x_ref[0]                        # (B, IN_PAD) f32 (zero-padded beyond 13)
    h = h_acc[...]                      # (B, HIDDEN) f32

    # fc1 + ReLU   (bf16 MXU, f32 accumulate)
    a = jnp.dot(x.astype(jnp.bfloat16), w1_ref[...],
                preferred_element_type=jnp.float32) + b1_ref[...]
    a = jnp.maximum(a, 0.0)             # (B, HIDDEN)

    # GRUCell (PyTorch gate order r, z, n); keep the 768-wide dots fused.
    gi = jnp.dot(a.astype(jnp.bfloat16), wih_ref[...],
                 preferred_element_type=jnp.float32)          # (B, 3H)
    gh = jnp.dot(h.astype(jnp.bfloat16), whh_ref[...],
                 preferred_element_type=jnp.float32)          # (B, 3H)

    rz = jax.nn.sigmoid(gi[:, :2 * HIDDEN] + gh[:, :2 * HIDDEN] + brz_ref[...])
    r = rz[:, :HIDDEN]
    z = rz[:, HIDDEN:]
    n = jnp.tanh(gi[:, 2 * HIDDEN:] + bin_ref[...]
                 + r * (gh[:, 2 * HIDDEN:] + bhn_ref[...]))
    h_new = (1.0 - z) * n + z * h                             # (B, HIDDEN) f32

    # fc2 (lane-dense padded output)
    q = jnp.dot(h_new.astype(jnp.bfloat16), w2_ref[...],
                preferred_element_type=jnp.float32) + b2_ref[...]

    q_ref[0] = q
    h_acc[...] = h_new

    @pl.when(t == pl.num_programs(0) - 1)
    def _():
        hn_ref[...] = h_new


def make_params(key):
    ks = jax.random.split(key, 8)
    w1 = 0.1 * jax.random.normal(ks[0], (IN_DIM, HIDDEN), jnp.float32)
    b1 = 0.05 * jax.random.normal(ks[1], (1, HIDDEN), jnp.float32)
    wih = 0.05 * jax.random.normal(ks[2], (HIDDEN, 3 * HIDDEN), jnp.float32)
    whh = 0.05 * jax.random.normal(ks[3], (HIDDEN, 3 * HIDDEN), jnp.float32)
    bih = 0.05 * jax.random.normal(ks[4], (1, 3 * HIDDEN), jnp.float32)
    bhh = 0.05 * jax.random.normal(ks[5], (1, 3 * HIDDEN), jnp.float32)
    w2 = 0.1 * jax.random.normal(ks[6], (HIDDEN, N_ACTIONS), jnp.float32)
    b2 = 0.05 * jax.random.normal(ks[7], (1, N_ACTIONS), jnp.float32)

    # Kernel-ready layout: pre-transposed (in, out), zero-padded lane-dense,
    # bf16 weights, pre-summed r/z biases; biases stay f32.
    w1p = jnp.zeros((IN_PAD, HIDDEN), jnp.float32).at[:IN_DIM].set(w1).astype(jnp.bfloat16)
    w2p = jnp.zeros((HIDDEN, OUT_PAD), jnp.float32).at[:, :N_ACTIONS].set(w2).astype(jnp.bfloat16)
    b2p = jnp.zeros((1, OUT_PAD), jnp.float32).at[:, :N_ACTIONS].set(b2)
    return dict(
        w1p=w1p, b1=b1,
        wih=wih.astype(jnp.bfloat16), whh=whh.astype(jnp.bfloat16),
        b_rz=bih[:, :2 * HIDDEN] + bhh[:, :2 * HIDDEN],
        b_in=bih[:, 2 * HIDDEN:], b_hn=bhh[:, 2 * HIDDEN:],
        w2p=w2p, b2p=b2p)


@jax.jit
def rnn_rollout(x_seq, h, params):
    """x_seq: (T, B, 13) f32, h: (..., B, 256) -> (q_seq (T, B, 25), h_T (B, 256))."""
    T, B, _ = x_seq.shape
    h2d = h.reshape(-1, HIDDEN).astype(jnp.float32)
    x_pad = jnp.pad(x_seq.astype(jnp.float32), ((0, 0), (0, 0), (0, IN_PAD - IN_DIM)))

    flops = 2 * T * B * (IN_PAD * HIDDEN + 2 * HIDDEN * 3 * HIDDEN + HIDDEN * OUT_PAD)
    transcendentals = T * B * 3 * HIDDEN
    weight_bytes = sum(int(params[k].size) * params[k].dtype.itemsize
                       for k in ("w1p", "wih", "whh", "w2p",
                                 "b1", "b_rz", "b_in", "b_hn", "b2p"))
    bytes_accessed = (weight_bytes + x_pad.size * 4
                      + T * B * OUT_PAD * 4 + 2 * B * HIDDEN * 4)

    const = lambda t: (0, 0)
    q_pad, h_T = pl.pallas_call(
        rnn_kernel,
        out_shape=(jax.ShapeDtypeStruct((T, B, OUT_PAD), jnp.float32),
                   jax.ShapeDtypeStruct((B, HIDDEN), jnp.float32)),
        grid_spec=pltpu.PrefetchScalarGridSpec(
            num_scalar_prefetch=0,
            grid=(T,),
            in_specs=[
                pl.BlockSpec((1, B, IN_PAD), lambda t: (t, 0, 0)),   # x_t (streamed)
                pl.BlockSpec((B, HIDDEN), const),                    # h0   (resident)
                pl.BlockSpec((IN_PAD, HIDDEN), const),               # w1   (resident)
                pl.BlockSpec((1, HIDDEN), const),                    # b1
                pl.BlockSpec((HIDDEN, 3 * HIDDEN), const),           # w_ih
                pl.BlockSpec((HIDDEN, 3 * HIDDEN), const),           # w_hh
                pl.BlockSpec((1, 2 * HIDDEN), const),                # b_rz (pre-summed)
                pl.BlockSpec((1, HIDDEN), const),                    # b_in
                pl.BlockSpec((1, HIDDEN), const),                    # b_hn
                pl.BlockSpec((HIDDEN, OUT_PAD), const),              # w2
                pl.BlockSpec((1, OUT_PAD), const),                   # b2
            ],
            out_specs=(
                pl.BlockSpec((1, B, OUT_PAD), lambda t: (t, 0, 0)),  # q_t
                pl.BlockSpec((B, HIDDEN), const),                    # h_T
            ),
            scratch_shapes=[pltpu.VMEM((B, HIDDEN), jnp.float32)],   # h carry
        ),
        compiler_params=pltpu.CompilerParams(
            dimension_semantics=("arbitrary",)),
        input_output_aliases={1: 1},                                 # h -> h_T in place
        cost_estimate=pl.CostEstimate(flops=flops,
                                      transcendentals=transcendentals,
                                      bytes_accessed=bytes_accessed),
    )(x_pad, h2d,
      params["w1p"], params["b1"],
      params["wih"], params["whh"], params["b_rz"], params["b_in"], params["b_hn"],
      params["w2p"], params["b2p"])
    return q_pad[:, :, :N_ACTIONS], h_T


def rnn_forward(x, h, params):
    """Single step, matching RNN.forward(x, h): x (B, 13), h (..., B, 256)."""
    q_seq, h_new = rnn_rollout(x[None], h, params)
    return q_seq[0], h_new


def reference_step(x, h, params):
    """Pure-JAX mirror of one forward step (same padded bf16 params)."""
    xp = jnp.pad(x, ((0, 0), (0, IN_PAD - IN_DIM))).astype(jnp.bfloat16)
    a = jnp.maximum(jnp.dot(xp, params["w1p"],
                            preferred_element_type=jnp.float32) + params["b1"], 0.0)
    gi = jnp.dot(a.astype(jnp.bfloat16), params["wih"], preferred_element_type=jnp.float32)
    gh = jnp.dot(h.astype(jnp.bfloat16), params["whh"], preferred_element_type=jnp.float32)
    rz = jax.nn.sigmoid(gi[:, :2 * HIDDEN] + gh[:, :2 * HIDDEN] + params["b_rz"])
    r, z = rz[:, :HIDDEN], rz[:, HIDDEN:]
    n = jnp.tanh(gi[:, 2 * HIDDEN:] + params["b_in"]
                 + r * (gh[:, 2 * HIDDEN:] + params["b_hn"]))
    h_new = (1.0 - z) * n + z * h
    q = jnp.dot(h_new.astype(jnp.bfloat16), params["w2p"],
                preferred_element_type=jnp.float32) + params["b2p"]
    return q[:, :N_ACTIONS], h_new


if __name__ == "__main__":
    key = jax.random.PRNGKey(0)
    kp, kx, kh, ks = jax.random.split(key, 4)
    params = make_params(kp)

    B = 8
    x = jax.random.normal(kx, (B, IN_DIM), dtype=jnp.float32)
    h0 = jax.random.normal(kh, (1, B, HIDDEN), dtype=jnp.float32)

    # Single step == nn.Module.forward(x, h)
    q, h_new = rnn_forward(x, h0, params)
    jax.block_until_ready((q, h_new))
    q_ref, h_ref = reference_step(x, h0.reshape(-1, HIDDEN), params)
    assert q.shape == (B, N_ACTIONS) and h_new.shape == (B, HIDDEN)
    assert jnp.allclose(q, q_ref, atol=2e-3, rtol=2e-3)
    assert jnp.allclose(h_new, h_ref, atol=2e-3, rtol=2e-3)

    # T-step rollout: weights stay resident in VMEM across the whole sequence.
    T = 8
    x_seq = jax.random.normal(ks, (T, B, IN_DIM), dtype=jnp.float32)
    q_seq, h_T = rnn_rollout(x_seq, h0, params)
    jax.block_until_ready((q_seq, h_T))

    def scan_step(h, xt):
        qt, hn = reference_step(xt, h, params)
        return hn, qt
    h_T_ref, q_seq_ref = jax.lax.scan(scan_step, h0.reshape(-1, HIDDEN), x_seq)
    assert q_seq.shape == (T, B, N_ACTIONS) and h_T.shape == (B, HIDDEN)
    assert jnp.allclose(q_seq, q_seq_ref, atol=5e-3, rtol=5e-3)
    assert jnp.allclose(h_T, h_T_ref, atol=5e-3, rtol=5e-3)

    print("KERNEL_OK")
</pallas_src>

<mosaic_0001>
module attributes {stable_mosaic.version = 11 : i64} {
  func.func @rnn_kernel(%arg0: i32, %arg1: memref<1x8x128xf32, #tpu.memory_space<vmem>>, %arg2: memref<8x256xf32, #tpu.memory_space<vmem>>, %arg3: memref<128x256xbf16, #tpu.memory_space<vmem>>, %arg4: memref<1x256xf32, #tpu.memory_space<vmem>>, %arg5: memref<256x768xbf16, #tpu.memory_space<vmem>>, %arg6: memref<256x768xbf16, #tpu.memory_space<vmem>>, %arg7: memref<1x512xf32, #tpu.memory_space<vmem>>, %arg8: memref<1x256xf32, #tpu.memory_space<vmem>>, %arg9: memref<1x256xf32, #tpu.memory_space<vmem>>, %arg10: memref<256x128xbf16, #tpu.memory_space<vmem>>, %arg11: memref<1x128xf32, #tpu.memory_space<vmem>>, %arg12: memref<1x8x128xf32, #tpu.memory_space<vmem>>, %arg13: memref<8x256xf32, #tpu.memory_space<vmem>>, %arg14: memref<8x256xf32, #tpu.memory_space<vmem>>) attributes {dimension_semantics = [#tpu.dimension_semantics<arbitrary>], iteration_bounds = array<i64: 1>, scalar_prefetch = 0 : i64, scratch_operands = 1 : i64, tpu.core_type = #tpu.core_type<tc>, window_params = [{transform_indices = @transform_0, window_bounds = array<i64: 1, 8, 128>}, {pipeline_mode = #tpu.pipeline_mode<synchronous>, transform_indices = @transform_1, window_bounds = array<i64: 8, 256>}, {pipeline_mode = #tpu.pipeline_mode<synchronous>, transform_indices = @transform_2, window_bounds = array<i64: 128, 256>}, {pipeline_mode = #tpu.pipeline_mode<synchronous>, transform_indices = @transform_3, window_bounds = array<i64: 1, 256>}, {pipeline_mode = #tpu.pipeline_mode<synchronous>, transform_indices = @transform_4, window_bounds = array<i64: 256, 768>}, {pipeline_mode = #tpu.pipeline_mode<synchronous>, transform_indices = @transform_5, window_bounds = array<i64: 256, 768>}, {pipeline_mode = #tpu.pipeline_mode<synchronous>, transform_indices = @transform_6, window_bounds = array<i64: 1, 512>}, {pipeline_mode = #tpu.pipeline_mode<synchronous>, transform_indices = @transform_7, window_bounds = array<i64: 1, 256>}, {pipeline_mode = #tpu.pipeline_mode<synchronous>, transform_indices = @transform_8, window_bounds = array<i64: 1, 256>}, {pipeline_mode = #tpu.pipeline_mode<synchronous>, transform_indices = @transform_9, window_bounds = array<i64: 256, 128>}, {pipeline_mode = #tpu.pipeline_mode<synchronous>, transform_indices = @transform_10, window_bounds = array<i64: 1, 128>}, {transform_indices = @transform_11, window_bounds = array<i64: 1, 8, 128>}, {pipeline_mode = #tpu.pipeline_mode<synchronous>, transform_indices = @transform_12, window_bounds = array<i64: 8, 256>}]} {
    %c0_i32 = arith.constant 0 : i32
    %0 = arith.cmpi eq, %arg0, %c0_i32 : i32
    %1 = arith.extui %0 : i1 to i32
    %c0_i32_0 = arith.constant 0 : i32
    %2 = arith.cmpi ne, %1, %c0_i32_0 : i32
    scf.if %2 {
      %c0_36 = arith.constant 0 : index
      %c0_37 = arith.constant 0 : index
      %62 = vector.load %arg2[%c0_36, %c0_37] : memref<8x256xf32, #tpu.memory_space<vmem>>, vector<8x256xf32>
      %c0_38 = arith.constant 0 : index
      %c0_39 = arith.constant 0 : index
      %63 = vector.load %arg14[%c0_38, %c0_39] : memref<8x256xf32, #tpu.memory_space<vmem>>, vector<8x256xf32>
      tpu.vector_store %arg14[%c0_38, %c0_39], %62 {strides = array<i32>} : memref<8x256xf32, #tpu.memory_space<vmem>>, vector<8x256xf32>,
    } else {
    }
    %c0 = arith.constant 0 : index
    %c0_1 = arith.constant 0 : index
    %c0_2 = arith.constant 0 : index
    %3 = vector.load %arg1[%c0, %c0_1, %c0_2] : memref<1x8x128xf32, #tpu.memory_space<vmem>>, vector<1x8x128xf32>
    %4 = vector.shape_cast %3 : vector<1x8x128xf32> to vector<8x128xf32>
    %c0_3 = arith.constant 0 : index
    %c0_4 = arith.constant 0 : index
    %5 = vector.load %arg14[%c0_3, %c0_4] : memref<8x256xf32, #tpu.memory_space<vmem>>, vector<8x256xf32>
    %6 = arith.truncf %4 : vector<8x128xf32> to vector<8x128xbf16>
    %c0_5 = arith.constant 0 : index
    %c0_6 = arith.constant 0 : index
    %7 = vector.load %arg3[%c0_5, %c0_6] : memref<128x256xbf16, #tpu.memory_space<vmem>>, vector<128x256xbf16>
    %cst = arith.constant dense<0.000000e+00> : vector<8x256xf32>
    %8 = tpu.matmul %6, %7, %cst {dimension_numbers = #tpu.dot_dimension_numbers<[1], [0], [0], [1], [0, 0, 1, 1], [], []>} : vector<8x128xbf16>, vector<128x256xbf16>, vector<8x256xf32> -> vector<8x256xf32>
    %c0_7 = arith.constant 0 : index
    %c0_8 = arith.constant 0 : index
    %9 = vector.load %arg4[%c0_7, %c0_8] : memref<1x256xf32, #tpu.memory_space<vmem>>, vector<1x256xf32>
    %10 = vector.broadcast %9 : vector<1x256xf32> to vector<8x256xf32>
    %11 = arith.addf %8, %10 : vector<8x256xf32>
    %cst_9 = arith.constant 0.000000e+00 : f32
    %12 = vector.broadcast %cst_9 : f32 to vector<8x256xf32>
    %13 = arith.maximumf %11, %12 : vector<8x256xf32>
    %14 = arith.truncf %13 : vector<8x256xf32> to vector<8x256xbf16>
    %c0_10 = arith.constant 0 : index
    %c0_11 = arith.constant 0 : index
    %15 = vector.load %arg5[%c0_10, %c0_11] : memref<256x768xbf16, #tpu.memory_space<vmem>>, vector<256x768xbf16>
    %cst_12 = arith.constant dense<0.000000e+00> : vector<8x768xf32>
    %16 = tpu.matmul %14, %15, %cst_12 {dimension_numbers = #tpu.dot_dimension_numbers<[1], [0], [0], [1], [0, 0, 1, 1], [], []>} : vector<8x256xbf16>, vector<256x768xbf16>, vector<8x768xf32> -> vector<8x768xf32>
    %17 = arith.truncf %5 : vector<8x256xf32> to vector<8x256xbf16>
    %c0_13 = arith.constant 0 : index
    %c0_14 = arith.constant 0 : index
    %18 = vector.load %arg6[%c0_13, %c0_14] : memref<256x768xbf16, #tpu.memory_space<vmem>>, vector<256x768xbf16>
    %cst_15 = arith.constant dense<0.000000e+00> : vector<8x768xf32>
    %19 = tpu.matmul %17, %18, %cst_15 {dimension_numbers = #tpu.dot_dimension_numbers<[1], [0], [0], [1], [0, 0, 1, 1], [], []>} : vector<8x256xbf16>, vector<256x768xbf16>, vector<8x768xf32> -> vector<8x768xf32>
    %20 = vector.extract_strided_slice %16 {offsets = [0, 0], sizes = [8, 512], strides = [1, 1]} : vector<8x768xf32> to vector<8x512xf32>
    %21 = vector.extract_strided_slice %19 {offsets = [0, 0], sizes = [8, 512], strides = [1, 1]} : vector<8x768xf32> to vector<8x512xf32>
    %22 = arith.addf %20, %21 : vector<8x512xf32>
    %c0_16 = arith.constant 0 : index
    %c0_17 = arith.constant 0 : index
    %23 = vector.load %arg7[%c0_16, %c0_17] : memref<1x512xf32, #tpu.memory_space<vmem>>, vector<1x512xf32>
    %24 = vector.broadcast %23 : vector<1x512xf32> to vector<8x512xf32>
    %25 = arith.addf %22, %24 : vector<8x512xf32>
    %26 = arith.negf %25 : vector<8x512xf32>
    %27 = math.exp %26 : vector<8x512xf32>
    %cst_18 = arith.constant 1.000000e+00 : f32
    %28 = vector.broadcast %cst_18 : f32 to vector<8x512xf32>
    %29 = arith.addf %28, %27 : vector<8x512xf32>
    %30 = arith.divf %28, %29 : vector<8x512xf32>
    %31 = vector.extract_strided_slice %30 {offsets = [0, 0], sizes = [8, 256], strides = [1, 1]} : vector<8x512xf32> to vector<8x256xf32>
    %32 = vector.extract_strided_slice %30 {offsets = [0, 256], sizes = [8, 256], strides = [1, 1]} : vector<8x512xf32> to vector<8x256xf32>
    %33 = vector.extract_strided_slice %16 {offsets = [0, 512], sizes = [8, 256], strides = [1, 1]} : vector<8x768xf32> to vector<8x256xf32>
    %c0_19 = arith.constant 0 : index
    %c0_20 = arith.constant 0 : index
    %34 = vector.load %arg8[%c0_19, %c0_20] : memref<1x256xf32, #tpu.memory_space<vmem>>, vector<1x256xf32>
    %35 = vector.broadcast %34 : vector<1x256xf32> to vector<8x256xf32>
    %36 = arith.addf %33, %35 : vector<8x256xf32>
    %37 = vector.extract_strided_slice %19 {offsets = [0, 512], sizes = [8, 256], strides = [1, 1]} : vector<8x768xf32> to vector<8x256xf32>
    %c0_21 = arith.constant 0 : index
    %c0_22 = arith.constant 0 : index
    %38 = vector.load %arg9[%c0_21, %c0_22] : memref<1x256xf32, #tpu.memory_space<vmem>>, vector<1x256xf32>
    %39 = vector.broadcast %38 : vector<1x256xf32> to vector<8x256xf32>
    %40 = arith.addf %37, %39 : vector<8x256xf32>
    %41 = arith.mulf %31, %40 : vector<8x256xf32>
    %42 = arith.addf %36, %41 : vector<8x256xf32>
    %43 = math.tanh %42 : vector<8x256xf32>
    %cst_23 = arith.constant 1.000000e+00 : f32
    %44 = vector.broadcast %cst_23 : f32 to vector<8x256xf32>
    %45 = arith.subf %44, %32 : vector<8x256xf32>
    %46 = arith.mulf %45, %43 : vector<8x256xf32>
    %47 = arith.mulf %32, %5 : vector<8x256xf32>
    %48 = arith.addf %46, %47 : vector<8x256xf32>
    %49 = arith.truncf %48 : vector<8x256xf32> to vector<8x256xbf16>
    %c0_24 = arith.constant 0 : index
    %c0_25 = arith.constant 0 : index
    %50 = vector.load %arg10[%c0_24, %c0_25] : memref<256x128xbf16, #tpu.memory_space<vmem>>, vector<256x128xbf16>
    %cst_26 = arith.constant dense<0.000000e+00> : vector<8x128xf32>
    %51 = tpu.matmul %49, %50, %cst_26 {dimension_numbers = #tpu.dot_dimension_numbers<[1], [0], [0], [1], [0, 0, 1, 1], [], []>} : vector<8x256xbf16>, vector<256x128xbf16>, vector<8x128xf32> -> vector<8x128xf32>
    %c0_27 = arith.constant 0 : index
    %c0_28 = arith.constant 0 : index
    %52 = vector.load %arg11[%c0_27, %c0_28] : memref<1x128xf32, #tpu.memory_space<vmem>>, vector<1x128xf32>
    %53 = vector.broadcast %52 : vector<1x128xf32> to vector<8x128xf32>
    %54 = arith.addf %51, %53 : vector<8x128xf32>
    %c0_29 = arith.constant 0 : index
    %c0_30 = arith.constant 0 : index
    %c0_31 = arith.constant 0 : index
    %55 = vector.load %arg12[%c0_29, %c0_30, %c0_31] : memref<1x8x128xf32, #tpu.memory_space<vmem>>, vector<1x8x128xf32>
    %56 = vector.shape_cast %55 : vector<1x8x128xf32> to vector<8x128xf32>
    %57 = vector.shape_cast %54 : vector<8x128xf32> to vector<1x8x128xf32>
    tpu.vector_store %arg12[%c0_29, %c0_30, %c0_31], %57 {strides = array<i32>} : memref<1x8x128xf32, #tpu.memory_space<vmem>>, vector<1x8x128xf32>,
    %c0_32 = arith.constant 0 : index
    %c0_33 = arith.constant 0 : index
    %58 = vector.load %arg14[%c0_32, %c0_33] : memref<8x256xf32, #tpu.memory_space<vmem>>, vector<8x256xf32>
    tpu.vector_store %arg14[%c0_32, %c0_33], %48 {strides = array<i32>} : memref<8x256xf32, #tpu.memory_space<vmem>>, vector<8x256xf32>,
    %c0_i32_34 = arith.constant 0 : i32
    %59 = arith.cmpi eq, %arg0, %c0_i32_34 : i32
    %60 = arith.extui %59 : i1 to i32
    %c0_i32_35 = arith.constant 0 : i32
    %61 = arith.cmpi ne, %60, %c0_i32_35 : i32
    scf.if %61 {
      %c0_36 = arith.constant 0 : index
      %c0_37 = arith.constant 0 : index
      %62 = vector.load %arg13[%c0_36, %c0_37] : memref<8x256xf32, #tpu.memory_space<vmem>>, vector<8x256xf32>
      tpu.vector_store %arg13[%c0_36, %c0_37], %48 {strides = array<i32>} : memref<8x256xf32, #tpu.memory_space<vmem>>, vector<8x256xf32>,
    } else {
    }
    return
  }
  func.func @transform_0(%arg0: i32) -> (i32, i32, i32) {
    %c0_i32 = arith.constant 0 : i32
    %c0_i32_0 = arith.constant 0 : i32
    %c0_i32_1 = arith.constant 0 : i32
    return %arg0, %c0_i32, %c0_i32_0 : i32, i32, i32
  }
  func.func @transform_1(%arg0: i32) -> (i32, i32) {
    %c0_i32 = arith.constant 0 : i32
    %c0_i32_0 = arith.constant 0 : i32
    %c0_i32_1 = arith.constant 0 : i32
    return %c0_i32, %c0_i32_0 : i32, i32
  }
  func.func @transform_2(%arg0: i32) -> (i32, i32) {
    %c0_i32 = arith.constant 0 : i32
    %c0_i32_0 = arith.constant 0 : i32
    %c0_i32_1 = arith.constant 0 : i32
    return %c0_i32, %c0_i32_0 : i32, i32
  }
  func.func @transform_3(%arg0: i32) -> (i32, i32) {
    %c0_i32 = arith.constant 0 : i32
    %c0_i32_0 = arith.constant 0 : i32
    %c0_i32_1 = arith.constant 0 : i32
    return %c0_i32, %c0_i32_0 : i32, i32
  }
  func.func @transform_4(%arg0: i32) -> (i32, i32) {
    %c0_i32 = arith.constant 0 : i32
    %c0_i32_0 = arith.constant 0 : i32
    %c0_i32_1 = arith.constant 0 : i32
    return %c0_i32, %c0_i32_0 : i32, i32
  }
  func.func @transform_5(%arg0: i32) -> (i32, i32) {
    %c0_i32 = arith.constant 0 : i32
    %c0_i32_0 = arith.constant 0 : i32
    %c0_i32_1 = arith.constant 0 : i32
    return %c0_i32, %c0_i32_0 : i32, i32
  }
  func.func @transform_6(%arg0: i32) -> (i32, i32) {
    %c0_i32 = arith.constant 0 : i32
    %c0_i32_0 = arith.constant 0 : i32
    %c0_i32_1 = arith.constant 0 : i32
    return %c0_i32, %c0_i32_0 : i32, i32
  }
  func.func @transform_7(%arg0: i32) -> (i32, i32) {
    %c0_i32 = arith.constant 0 : i32
    %c0_i32_0 = arith.constant 0 : i32
    %c0_i32_1 = arith.constant 0 : i32
    return %c0_i32, %c0_i32_0 : i32, i32
  }
  func.func @transform_8(%arg0: i32) -> (i32, i32) {
    %c0_i32 = arith.constant 0 : i32
    %c0_i32_0 = arith.constant 0 : i32
    %c0_i32_1 = arith.constant 0 : i32
    return %c0_i32, %c0_i32_0 : i32, i32
  }
  func.func @transform_9(%arg0: i32) -> (i32, i32) {
    %c0_i32 = arith.constant 0 : i32
    %c0_i32_0 = arith.constant 0 : i32
    %c0_i32_1 = arith.constant 0 : i32
    return %c0_i32, %c0_i32_0 : i32, i32
  }
  func.func @transform_10(%arg0: i32) -> (i32, i32) {
    %c0_i32 = arith.constant 0 : i32
    %c0_i32_0 = arith.constant 0 : i32
    %c0_i32_1 = arith.constant 0 : i32
    return %c0_i32, %c0_i32_0 : i32, i32
  }
  func.func @transform_11(%arg0: i32) -> (i32, i32, i32) {
    %c0_i32 = arith.constant 0 : i32
    %c0_i32_0 = arith.constant 0 : i32
    %c0_i32_1 = arith.constant 0 : i32
    return %arg0, %c0_i32, %c0_i32_0 : i32, i32, i32
  }
  func.func @transform_12(%arg0: i32) -> (i32, i32) {
    %c0_i32 = arith.constant 0 : i32
    %c0_i32_0 = arith.constant 0 : i32
    %c0_i32_1 = arith.constant 0 : i32
    return %c0_i32, %c0_i32_0 : i32, i32
  }
}

</mosaic_0001>

<bundles_post_ra>
// kernel: rnn_rollout.1
= control target key start
LH: loop header
LB: loop body
LE: loop exit
PB: predicated region body
PF: predicated region fallthrough
CT: control target
= control target key end

     0   :  { %18 = vsyncpa [#allocation4], 0  ;;  %s2860_s0 = inlined_call_operand.vmem [shape: f32[1,8,128], index: 0, kind: input, shape index: {}]   ;;  %s2861_s1 = inlined_call_operand.vmem [shape: f32[8,256], index: 1, kind: input, shape index: {}, may-alias: {1,12}]   ;;  %s2862_s2 = inlined_call_operand.hbm [shape: bf16[128,256], index: 2, kind: input, shape index: {}]   ;;  %s2863_s3 = inlined_call_operand.vmem [shape: f32[1,256], index: 3, kind: input, shape index: {}]   ;;  %s2864_s4 = inlined_call_operand.hbm [shape: bf16[256,768], index: 4, kind: input, shape index: {}]   ;;  %s2865_s5 = inlined_call_operand.hbm [shape: bf16[256,768], index: 5, kind: input, shape index: {}]   ;;  %s2866_s6 = inlined_call_operand.vmem [shape: f32[1,512], index: 6, kind: input, shape index: {}]   ;;  %s2867_s7 = inlined_call_operand.vmem [shape: f32[1,256], index: 7, kind: input, shape index: {}]   ;;  %s2868_s8 = inlined_call_operand.vmem [shape: f32[1,256], index: 8, kind: input, shape index: {}]   ;;  %s2869_s9 = inlined_call_operand.hbm [shape: bf16[256,128], index: 9, kind: input, shape index: {}]   ;;  %s2870_s10 = inlined_call_operand.vmem [shape: f32[1,128], index: 10, kind: input, shape index: {}]   ;;  %s2871_s11 = inlined_call_operand.hbm [shape: f32[1,8,128], index: 11, kind: output, shape index: {0}]   ;;  %s2872_s12 = inlined_call_operand.vmem [shape: f32[8,256], index: 12, kind: output, shape index: {1}, may-alias: {1,12}]  }
   0x1   :  { %19 = vsyncpa [#allocation7], 0 }
   0x2   :  { %20 = vsyncpa [#allocation10], 0 }
   0x3   :  { %21 = vsyncpa [#allocation5], 0  ;;  %s2683_s21 = smov [#allocation6]  }
   0x4   :  { %s45_s22 = sshll.u32 %s2683_s21, 4  ;;  %s46_s22 = int_to_ptr.vmem [resolvable:$true] %s45_s22 }
   0x5   :  { %s2583_s23 = scalar_lea.vmem %s46_s22, 12288  ;;  %p2588_p1 = scmp.lt.s32.totalorder %s46_s22, %s46_s22 }
   0x6   :  { %p2584_p0 = scmp.ne.s32.totalorder %s46_s22, %s2583_s23  ;;  %p2589_p2 = scmp.lt.s32.totalorder %s2583_s23, %s2583_s23 }
   0x8   :  { %p2590_p3 = por %p2589_p2, %p2588_p1 }
   0xa   :  { %p2591_p4 = pnand %p2590_p3, %p2584_p0 }
   0xc   :  { %2594 = shalt.err (!%p2591_p4)
}
   0xd   :  { %s2684_s24 = smov 384   ;;  %s2685_s25 = smov 24  }
   0xe   :  { %51 = dma.hbm_to_vmem [thread:$0]  %s2864_s4, 12288, %s46_s22, [#allocation7], %s2684_s24, %s2684_s24, %s2685_s25  }
   0xf   :  { %s2686_s28 = smov [#allocation3]  }
  0x10   :  { %s31_s29 = sshll.u32 %s2686_s28, 4  ;;  %s32_s29 = int_to_ptr.vmem [resolvable:$true] %s31_s29 }
  0x11   :  { %s2603_s30 = scalar_lea.vmem %s32_s29, 2048  ;;  %p2608_p6 = scmp.lt.s32.totalorder %s32_s29, %s32_s29 }
  0x12   :  { %p2604_p5 = scmp.ne.s32.totalorder %s32_s29, %s2603_s30  ;;  %p2609_p7 = scmp.lt.s32.totalorder %s2603_s30, %s2603_s30 }
  0x14   :  { %p2610_p8 = por %p2609_p7, %p2608_p6 }
  0x16   :  { %p2611_p9 = pnand %p2610_p8, %p2604_p5 }
  0x18   :  { %2614 = shalt.err (!%p2611_p9)
}
  0x19   :  { %s2687_s13 = smov 128   ;;  %s2688_s14 = smov 8  }
  0x1a   :  { %37 = dma.hbm_to_vmem [thread:$0]  %s2862_s2, 2048, %s32_s29, [#allocation4], %s2687_s13, %s2687_s13, %s2688_s14  }
  0x1b   :  { %s2689_s17 = smov [#allocation8]   ;;  %s2690_s19 = smov [#allocation9]  }
  0x1c   :  { %s57_s18 = sshll.u32 %s2689_s17, 4  ;;  %s75_s4 = sshll.u32 %s2690_s19, 4  ;;  %s58_s18 = int_to_ptr.vmem [resolvable:$true] %s57_s18  ;;  %s76_s4 = int_to_ptr.vmem [resolvable:$true] %s75_s4 }
  0x1d   :  { %s2623_s20 = scalar_lea.vmem %s58_s18, 12288  ;;  %p2628_p11 = scmp.lt.s32.totalorder %s58_s18, %s58_s18 }
  0x1e   :  { %p2624_p10 = scmp.ne.s32.totalorder %s58_s18, %s2623_s20  ;;  %p2629_p12 = scmp.lt.s32.totalorder %s2623_s20, %s2623_s20 }
  0x20   :  { %p2630_p13 = por %p2629_p12, %p2628_p11 }
  0x22   :  { %p2631_p0 = pnand %p2630_p13, %p2624_p10 }
  0x24   :  { %2634 = shalt.err (!%p2631_p0)
}
  0x25   :  { %63 = dma.hbm_to_vmem [thread:$0]  %s2865_s5, 12288, %s58_s18, [#allocation7], %s2684_s24, %s2684_s24, %s2685_s25  }
  0x26   :  { %s2643_s2 = scalar_lea.vmem %s76_s4, 2048  ;;  %p2648_p2 = scmp.lt.s32.totalorder %s76_s4, %s76_s4 }
  0x27   :  { %p2644_p1 = scmp.ne.s32.totalorder %s76_s4, %s2643_s2  ;;  %p2649_p3 = scmp.lt.s32.totalorder %s2643_s2, %s2643_s2 }
  0x29   :  { %p2650_p4 = por %p2649_p3, %p2648_p2 }
  0x2b   :  { %p2651_p5 = pnand %p2650_p4, %p2644_p1 }
  0x2d   :  { %2654 = shalt.err (!%p2651_p5)
}
  0x2e   :  { %s2691_s23 = smov 64   ;;  %s2692_s26 = smov 4  }
  0x2f   :  { %81 = dma.hbm_to_vmem [thread:$0]  %s2869_s9, 2048, %s76_s4, [#allocation10], %s2691_s23, %s2691_s23, %s2692_s26  }
  0x30   :  { %2675 = dma.done.wait [#allocation4], 2048  }
  0x31   :  { %2676 = vsyncadd [#allocation4], 4294965248 }
  0x32   :  { %2677 = dma.done.wait [#allocation7], 24576  }
  0x33   :  { %2678 = vsyncadd [#allocation7], 4294942720 }
  0x34   :  { %2679 = dma.done.wait [#allocation10], 2048  }
  0x35   :  { %2680 = vsyncadd [#allocation10], 4294965248  ;;  %v2693_v0 = vmov 0   ;;  %v2227_v1 = vld [vmem:[#allocation3 + $0x74] ss:$8 sps:$4 sm:$0xff]   ;;  %v105_v26 = vld [vmem:[%s2860_s0] sm:$0xff] }
  0x36   :  { %249 = vmatprep.mubr.bf16.mxu0 %v2693_v0  ;;  %v2229_v2 = vld [vmem:[#allocation3 + $0x70] ss:$8 sps:$4 sm:$0xff]   ;;  %217 = vmatprep.subr.bf16.mxu0 %v2227_v1  ;;  %v2230_v3 = vld [vmem:[#allocation3 + $0x64] ss:$8 sps:$4 sm:$0xff]   ;;  %v2232_v4 = vld [vmem:[#allocation3 + $0x60] ss:$8 sps:$4 sm:$0xff]   ;;  %v108_v30 = vpack.c.bf16 %v105_v26, %v105_v26 }
  0x37   :  { %218 = vmatpush1.bf16.msra.mxu0 %v2229_v2  ;;  %v2233_v5 = vld [vmem:[#allocation3 + $0x54] ss:$8 sps:$4 sm:$0xff]   ;;  %v2235_v6 = vld [vmem:[#allocation3 + $0x50] ss:$8 sps:$4 sm:$0xff]   ;;  %v2236_v7 = vld [vmem:[#allocation3 + $0x44] ss:$8 sps:$4 sm:$0xff]  }
  0x38   :  { %219 = vmatprep.subr.bf16.mxu0 %v2230_v3  ;;  %v2238_v8 = vld [vmem:[#allocation3 + $0x40] ss:$8 sps:$4 sm:$0xff]   ;;  %v2251_v9 = vld [vmem:[#allocation6 + $0x154] ss:$24 sps:$4 sm:$0xff]   ;;  %v2257_v12 = vld [vmem:[#allocation6 + $0x124] ss:$24 sps:$4 sm:$0xff]  }
  0x39   :  { %v2239_v10 = vld [vmem:[#allocation3 + $0x34] ss:$8 sps:$4 sm:$0xff]   ;;  %838 = vmatprep.subr.bf16.mxu1 %v2251_v9  ;;  %v2256_v11 = vld [vmem:[#allocation6 + $0x150] ss:$24 sps:$4 sm:$0xff]   ;;  %v2242_v14 = vld [vmem:[#allocation3 + $0x24] ss:$8 sps:$4 sm:$0xff]  }
  0x3a   :  { %v2241_v13 = vld [vmem:[#allocation3 + $0x30] ss:$8 sps:$4 sm:$0xff]   ;;  %839 = vmatpush1.bf16.msra.mxu1 %v2256_v11  ;;  %v2263_v16 = vld [vmem:[#allocation6 + $0xf4] ss:$24 sps:$4 sm:$0xff]   ;;  %v2244_v17 = vld [vmem:[#allocation3 + $0x20] ss:$8 sps:$4 sm:$0xff]  }
  0x3b   :  { %220 = vmatpush1.bf16.msra.mxu0 %v2232_v4  ;;  %840 = vmatprep.subr.bf16.mxu1 %v2257_v12  ;;  %v2262_v15 = vld [vmem:[#allocation6 + $0x120] ss:$24 sps:$4 sm:$0xff]   ;;  %v2245_v18 = vld [vmem:[#allocation3 + $0x14] ss:$8 sps:$4 sm:$0xff]   ;;  %v2268_v19 = vld [vmem:[#allocation6 + $0xf0] ss:$24 sps:$4 sm:$0xff]  }
  0x3c   :  { %221 = vmatprep.subr.bf16.mxu0 %v2233_v5  ;;  %v2269_v20 = vld [vmem:[#allocation6 + $0xc4] ss:$24 sps:$4 sm:$0xff]   ;;  %v2247_v21 = vld [vmem:[#allocation3 + $0x10] ss:$8 sps:$4 sm:$0xff]   ;;  %v2275_v24 = vld [vmem:[#allocation6 + $0x94] ss:$24 sps:$4 sm:$0xff]  }
  0x3d   :  { %v2248_v22 = vld [vmem:[#allocation3 + $0x4] ss:$8 sps:$4 sm:$0xff]   ;;  %v2274_v23 = vld [vmem:[#allocation6 + $0xc0] ss:$24 sps:$4 sm:$0xff]   ;;  %v2255_v27 = vld [vmem:[#allocation6 + $0x15c] ss:$24 sps:$4 sm:$0xff]  }
  0x3e   :  { %841 = vmatpush1.bf16.msra.mxu1 %v2262_v15  ;;  %v2250_v25 = vld [vmem:[#allocation3] ss:$8 sps:$4 sm:$0xff]   ;;  %v2281_v29 = vld [vmem:[#allocation6 + $0x64] ss:$24 sps:$4 sm:$0xff]   ;;  %v2253_v31 = vld [vmem:[#allocation6 + $0x158] ss:$24 sps:$4 sm:$0xff]  }
  0x3f   :  { %222 = vmatpush1.bf16.msra.mxu0 %v2235_v6  ;;  %842 = vmatprep.subr.bf16.mxu1 %v2263_v16  ;;  %v2280_v28 = vld [vmem:[#allocation6 + $0x90] ss:$24 sps:$4 sm:$0xff]   ;;  %v2261_v32 = vld [vmem:[#allocation6 + $0x12c] ss:$24 sps:$4 sm:$0xff]   ;;  %v2286_v33 = vld [vmem:[#allocation6 + $0x60] ss:$24 sps:$4 sm:$0xff]  }
  0x40   :  { %223 = vmatprep.subr.bf16.mxu0 %v2236_v7  ;;  %v2287_v34 = vld [vmem:[#allocation6 + $0x34] ss:$24 sps:$4 sm:$0xff]   ;;  %v2259_v35 = vld [vmem:[#allocation6 + $0x128] ss:$24 sps:$4 sm:$0xff]   ;;  %v2293_v38 = vld [vmem:[#allocation6 + $0x4] ss:$24 sps:$4 sm:$0xff]  }
  0x41   :  { %v2267_v36 = vld [vmem:[#allocation6 + $0xfc] ss:$24 sps:$4 sm:$0xff]   ;;  %v2292_v37 = vld [vmem:[#allocation6 + $0x30] ss:$24 sps:$4 sm:$0xff]   ;;  %v2273_v40 = vld [vmem:[#allocation6 + $0xcc] ss:$24 sps:$4 sm:$0xff]  }
  0x42   :  { %843 = vmatpush1.bf16.msra.mxu1 %v2268_v19  ;;  %v2265_v39 = vld [vmem:[#allocation6 + $0xf8] ss:$24 sps:$4 sm:$0xff]   ;;  %v2299_v42 = vld [vmem:[#allocation6 + $0x2d4] ss:$24 sps:$4 sm:$0xff]   ;;  %v2271_v43 = vld [vmem:[#allocation6 + $0xc8] ss:$24 sps:$4 sm:$0xff]  }
  0x43   :  { %224 = vmatpush1.bf16.msra.mxu0 %v2238_v8  ;;  %844 = vmatprep.subr.bf16.mxu1 %v2269_v20  ;;  %v2298_v41 = vld [vmem:[#allocation6] ss:$24 sps:$4 sm:$0xff]   ;;  %v2279_v44 = vld [vmem:[#allocation6 + $0x9c] ss:$24 sps:$4 sm:$0xff]   ;;  %v2304_v45 = vld [vmem:[#allocation6 + $0x2d0] ss:$24 sps:$4 sm:$0xff]  }
  0x44   :  { %225 = vmatprep.subr.bf16.mxu0 %v2239_v10  ;;  %v2305_v46 = vld [vmem:[#allocation6 + $0x2a4] ss:$24 sps:$4 sm:$0xff]   ;;  %v2277_v47 = vld [vmem:[#allocation6 + $0x98] ss:$24 sps:$4 sm:$0xff]   ;;  %v2311_v50 = vld [vmem:[#allocation6 + $0x274] ss:$24 sps:$4 sm:$0xff]  }
  0x45   :  { %v2310_v48 = vld [vmem:[#allocation6 + $0x2a0] ss:$24 sps:$4 sm:$0xff]   ;;  %v2285_v49 = vld [vmem:[#allocation6 + $0x6c] ss:$24 sps:$4 sm:$0xff]   ;;  %v2316_v52 = vld [vmem:[#allocation6 + $0x270] ss:$24 sps:$4 sm:$0xff]  }
  0x46   :  { %845 = vmatpush1.bf16.msra.mxu1 %v2274_v23  ;;  %v2283_v51 = vld [vmem:[#allocation6 + $0x68] ss:$24 sps:$4 sm:$0xff]   ;;  %v2291_v53 = vld [vmem:[#allocation6 + $0x3c] ss:$24 sps:$4 sm:$0xff]   ;;  %v2289_v55 = vld [vmem:[#allocation6 + $0x38] ss:$24 sps:$4 sm:$0xff]  }
  0x47   :  { %226 = vmatpush1.bf16.msra.mxu0 %v2241_v13  ;;  %846 = vmatprep.subr.bf16.mxu1 %v2275_v24  ;;  %v2317_v54 = vld [vmem:[#allocation6 + $0x244] ss:$24 sps:$4 sm:$0xff]   ;;  %v2322_v56 = vld [vmem:[#allocation6 + $0x240] ss:$24 sps:$4 sm:$0xff]   ;;  %v2323_v58 = vld [vmem:[#allocation6 + $0x214] ss:$24 sps:$4 sm:$0xff]  }
  0x48   :  { %227 = vmatprep.subr.bf16.mxu0 %v2242_v14  ;;  %v2297_v57 = vld [vmem:[#allocation6 + $0xc] ss:$24 sps:$4 sm:$0xff]   ;;  %v2295_v59 = vld [vmem:[#allocation6 + $0x8] ss:$24 sps:$4 sm:$0xff]   ;;  %v2303_v61 = vld [vmem:[#allocation6 + $0x2dc] ss:$24 sps:$4 sm:$0xff]  }
  0x49   :  { %v2328_v60 = vld [vmem:[#allocation6 + $0x210] ss:$24 sps:$4 sm:$0xff]   ;;  %v2329_v62 = vld [vmem:[#allocation6 + $0x1e4] ss:$24 sps:$4 sm:$0xff]   ;;  %v2334_v0 = vld [vmem:[#allocation6 + $0x1e0] ss:$24 sps:$4 sm:$0xff]  }
  0x4a   :  { %847 = vmatpush1.bf16.msra.mxu1 %v2280_v28  ;;  %v2301_v63 = vld [vmem:[#allocation6 + $0x2d8] ss:$24 sps:$4 sm:$0xff]   ;;  %v2309_v1 = vld [vmem:[#allocation6 + $0x2ac] ss:$24 sps:$4 sm:$0xff]   ;;  %v2307_v2 = vld [vmem:[#allocation6 + $0x2a8] ss:$24 sps:$4 sm:$0xff]  }
  0x4b   :  { %228 = vmatpush1.bf16.msra.mxu0 %v2244_v17  ;;  %848 = vmatprep.subr.bf16.mxu1 %v2281_v29  ;;  %v2315_v3 = vld [vmem:[#allocation6 + $0x27c] ss:$24 sps:$4 sm:$0xff]   ;;  %v2313_v4 = vld [vmem:[#allocation6 + $0x278] ss:$24 sps:$4 sm:$0xff]   ;;  %v2321_v5 = vld [vmem:[#allocation6 + $0x24c] ss:$24 sps:$4 sm:$0xff]  }
  0x4c   :  { %229 = vmatprep.subr.bf16.mxu0 %v2245_v18  ;;  %v2319_v6 = vld [vmem:[#allocation6 + $0x248] ss:$24 sps:$4 sm:$0xff]   ;;  %v2327_v7 = vld [vmem:[#allocation6 + $0x21c] ss:$24 sps:$4 sm:$0xff]   ;;  %v2325_v8 = vld [vmem:[#allocation6 + $0x218] ss:$24 sps:$4 sm:$0xff]  }
  0x4d   :  { %v2333_v9 = vld [vmem:[#allocation6 + $0x1ec] ss:$24 sps:$4 sm:$0xff]   ;;  %v2331_v10 = vld [vmem:[#allocation6 + $0x1e8] ss:$24 sps:$4 sm:$0xff]   ;;  %v2339_v12 = vld [vmem:[#allocation6 + $0x1bc] ss:$24 sps:$4 sm:$0xff]  }
  0x4e   :  { %849 = vmatpush1.bf16.msra.mxu1 %v2286_v33  ;;  %v2335_v11 = vld [vmem:[#allocation6 + $0x1b4] ss:$24 sps:$4 sm:$0xff]   ;;  %v2337_v13 = vld [vmem:[#allocation6 + $0x1b8] ss:$24 sps:$4 sm:$0xff]   ;;  %v2341_v15 = vld [vmem:[#allocation6 + $0x184] ss:$24 sps:$4 sm:$0xff]  }
  0x4f   :  { %230 = vmatpush1.bf16.msra.mxu0 %v2247_v21  ;;  %850 = vmatprep.subr.bf16.mxu1 %v2287_v34  ;;  %v2340_v14 = vld [vmem:[#allocation6 + $0x1b0] ss:$24 sps:$4 sm:$0xff]   ;;  %v2345_v16 = vld [vmem:[#allocation6 + $0x18c] ss:$24 sps:$4 sm:$0xff]   ;;  %v2346_v18 = vld [vmem:[#allocation6 + $0x180] ss:$24 sps:$4 sm:$0xff]   ;;  %v127_v21 = vlaneseq }
  0x50   :  { %231 = vmatprep.subr.bf16.mxu0 %v2248_v22  ;;  %v2343_v17 = vld [vmem:[#allocation6 + $0x188] ss:$24 sps:$4 sm:$0xff]   ;;  %v2349_v19 = vld [vmem:[#allocation6 + $0x164] ss:$24 sps:$4 sm:$0xff]   ;;  %v2352_v20 = vld [vmem:[#allocation8 + $0x154] ss:$24 sps:$4 sm:$0xff]  }
  0x51   :  { %v2781_v22 = vshrl.u32 %v127_v21, 7  ;;  %v125_v24 = vld [vmem:[%s2863_s3] sm:$0x3]  ;;  %s2694_s20 = smov [#allocation11]  }
  0x52   :  { %851 = vmatpush1.bf16.msra.mxu1 %v2292_v37  ;;  %v2416_v21 = vld [vmem:[#allocation8 + $0x240] ss:$24 sps:$4 sm:$0xff]   ;;  %s1949_s21 = sshll.u32 %s2694_s20, 4  ;;  %s1950_s21 = int_to_ptr.vmem [resolvable:$true] %s1949_s21 }
  0x53   :  { %232 = vmatpush1.bf16.msra.mxu0 %v2250_v25  ;;  %852 = vmatprep.subr.bf16.mxu1 %v2293_v38  ;;  %v2784_v23 = vsub.s32 0, %v2781_v22  ;;  %v2790_v25 = vsub.s32 1, %v2781_v22  ;;  %v2347_v38 = vld [vmem:[#allocation6 + $0x160] ss:$24 sps:$4 sm:$0xff]   ;;  %s2655_s22 = scalar_lea.vmem %s1950_s21, 128  ;;  %p2660_p7 = scmp.lt.s32.totalorder %s1950_s21, %s1950_s21 }
  0x54   :  { %879 = vmatprep.subr.bf16.mxu0 %v2255_v27  ;;  %p2656_p6 = scmp.ne.s32.totalorder %s1950_s21, %s2655_s22  ;;  %p2661_p8 = scmp.lt.s32.totalorder %s2655_s22, %s2655_s22 }
  0x55   :  { %v130_v26 = vrot.slane %v125_v24, %v2784_v23  ;;  %v134_v27 = vrot.slane %v125_v24, %v2790_v25  ;;  %v2421_v24 = vld [vmem:[#allocation6 + $0x224] ss:$24 sps:$4 sm:$0xff]  }
  0x56   :  { %250 = vmatmul.mubr.bf16.vlgmr.msra.gmra.mxu0 %v108_v30  ;;  %853 = vmatpush1.bf16.msra.mxu1 %v2298_v41  ;;  %v2355_v41 = vld [vmem:[#allocation6 + $0x134] ss:$24 sps:$4 sm:$0xff]   ;;  %p2662_p9 = por %p2661_p8, %p2660_p7 }
  0x57   :  { %880 = vmatpush1.bf16.msra.mxu0 %v2253_v31  ;;  %854 = vmatprep.subr.bf16.mxu1 %v2299_v42  ;;  %v2358_v42 = vld [vmem:[#allocation8 + $0x124] ss:$24 sps:$4 sm:$0xff]  }
  0x58   :  { %881 = vmatprep.subr.bf16.mxu0 %v2261_v32  ;;  %p2663_p10 = pnand %p2662_p9, %p2656_p6 }
  0x5a   :  { %855 = vmatpush2.bf16.msra.mxu1 %v2304_v45  ;;  %v2356_v45 = vld [vmem:[#allocation8 + $0x120] ss:$24 sps:$4 sm:$0xff]  }
  0x5b   :  { %882 = vmatpush1.bf16.msra.mxu0 %v2259_v35  ;;  %856 = vmatprep.subr.bf16.mxu1 %v2305_v46  ;;  %v2361_v46 = vld [vmem:[#allocation6 + $0x104] ss:$24 sps:$4 sm:$0xff]  }
  0x5c   :  { %883 = vmatprep.subr.bf16.mxu0 %v2267_v36  ;;  %v2797_v36 = vld [vmem:[%s2861_s1 + $0x8] sm:$0xff] }
  0x5e   :  { %857 = vmatpush2.bf16.msra.mxu1 %v2310_v48  ;;  %v2359_v48 = vld [vmem:[#allocation6 + $0x100] ss:$24 sps:$4 sm:$0xff]  }
  0x5f   :  { %884 = vmatpush1.bf16.msra.mxu0 %v2265_v39  ;;  %858 = vmatprep.subr.bf16.mxu1 %v2311_v50  ;;  %v2350_v39 = vld [vmem:[#allocation8 + $0x150] ss:$24 sps:$4 sm:$0xff]   ;;  %v2367_v50 = vld [vmem:[#allocation6 + $0xd4] ss:$24 sps:$4 sm:$0xff]  }
  0x60   :  { %885 = vmatprep.subr.bf16.mxu0 %v2273_v40 }
  0x62   :  { %859 = vmatpush2.bf16.msra.mxu1 %v2316_v52  ;;  %v2365_v52 = vld [vmem:[#allocation6 + $0xd0] ss:$24 sps:$4 sm:$0xff]  }
  0x63   :  { %886 = vmatpush1.bf16.msra.mxu0 %v2271_v43  ;;  %860 = vmatprep.subr.bf16.mxu1 %v2317_v54  ;;  %v2803_v43 = vpack.c.bf16 %v2797_v36, %v2797_v36  ;;  %v2373_v54 = vld [vmem:[#allocation6 + $0xa4] ss:$24 sps:$4 sm:$0xff]  }
  0x64   :  { %887 = vmatprep.subr.bf16.mxu0 %v2279_v44  ;;  %v2353_v44 = vld [vmem:[#allocation6 + $0x130] ss:$24 sps:$4 sm:$0xff]  }
  0x66   :  { %861 = vmatpush2.bf16.msra.mxu1 %v2322_v56  ;;  %v2371_v56 = vld [vmem:[#allocation6 + $0xa0] ss:$24 sps:$4 sm:$0xff]  }
  0x67   :  { %888 = vmatpush1.bf16.msra.mxu0 %v2277_v47  ;;  %862 = vmatprep.subr.bf16.mxu1 %v2323_v58  ;;  %v2364_v47 = vld [vmem:[#allocation8 + $0xf4] ss:$24 sps:$4 sm:$0xff]  }
  0x68   :  { %889 = vmatprep.subr.bf16.mxu0 %v2285_v49  ;;  %v2362_v49 = vld [vmem:[#allocation8 + $0xf0] ss:$24 sps:$4 sm:$0xff]   ;;  %v2379_v58 = vld [vmem:[#allocation6 + $0x74] ss:$24 sps:$4 sm:$0xff]  }
  0x6a   :  { %863 = vmatpush2.bf16.msra.mxu1 %v2328_v60  ;;  %v2377_v60 = vld [vmem:[#allocation6 + $0x70] ss:$24 sps:$4 sm:$0xff]  }
  0x6b   :  { %890 = vmatpush1.bf16.msra.mxu0 %v2283_v51  ;;  %864 = vmatprep.subr.bf16.mxu1 %v2329_v62  ;;  %v2370_v51 = vld [vmem:[#allocation8 + $0xc4] ss:$24 sps:$4 sm:$0xff]  }
  0x6c   :  { %891 = vmatprep.subr.bf16.mxu0 %v2291_v53  ;;  %v2368_v53 = vld [vmem:[#allocation8 + $0xc0] ss:$24 sps:$4 sm:$0xff]   ;;  %v2385_v62 = vld [vmem:[#allocation6 + $0x44] ss:$24 sps:$4 sm:$0xff]  }
  0x6e   :  { %865 = vmatpush2.bf16.msra.mxu1 %v2334_v0  ;;  %v2383_v0 = vld [vmem:[#allocation6 + $0x40] ss:$24 sps:$4 sm:$0xff]  }
  0x6f   :  { %892 = vmatpush1.bf16.msra.mxu0 %v2289_v55  ;;  %866 = vmatprep.subr.bf16.mxu1 %v2335_v11  ;;  %v2376_v55 = vld [vmem:[#allocation8 + $0x94] ss:$24 sps:$4 sm:$0xff]   ;;  %v2406_v11 = vld [vmem:[#allocation8 + $0x2a4] ss:$24 sps:$4 sm:$0xff]  }
  0x70   :  { %893 = vmatprep.subr.bf16.mxu0 %v2297_v57  ;;  %v2374_v57 = vld [vmem:[#allocation8 + $0x90] ss:$24 sps:$4 sm:$0xff]  }
  0x72   :  { %867 = vmatpush2.bf16.msra.mxu1 %v2340_v14  ;;  %v2409_v14 = vld [vmem:[#allocation6 + $0x284] ss:$24 sps:$4 sm:$0xff]  }
  0x73   :  { %894 = vmatpush1.bf16.msra.mxu0 %v2295_v59  ;;  %868 = vmatprep.subr.bf16.mxu1 %v2341_v15  ;;  %v2382_v59 = vld [vmem:[#allocation8 + $0x64] ss:$24 sps:$4 sm:$0xff]   ;;  %v2412_v15 = vld [vmem:[#allocation8 + $0x274] ss:$24 sps:$4 sm:$0xff]  }
  0x74   :  { %895 = vmatprep.subr.bf16.mxu0 %v2303_v61  ;;  %v2380_v61 = vld [vmem:[#allocation8 + $0x60] ss:$24 sps:$4 sm:$0xff]  }
  0x76   :  { %869 = vmatpush2.bf16.msra.mxu1 %v2346_v18  ;;  %v2415_v18 = vld [vmem:[#allocation6 + $0x254] ss:$24 sps:$4 sm:$0xff]  }
  0x77   :  { %896 = vmatpush2.bf16.msra.mxu0 %v2301_v63  ;;  %920 = vmatprep.subr.bf16.mxu1 %v2349_v19  ;;  %v2388_v63 = vld [vmem:[#allocation8 + $0x34] ss:$24 sps:$4 sm:$0xff]   ;;  %v2418_v19 = vld [vmem:[#allocation8 + $0x244] ss:$24 sps:$4 sm:$0xff]  }
  0x78   :  { %897 = vmatprep.subr.bf16.mxu0 %v2309_v1  ;;  %v2386_v1 = vld [vmem:[#allocation8 + $0x30] ss:$24 sps:$4 sm:$0xff]  }
  0x7b   :  { %898 = vmatpush2.bf16.msra.mxu0 %v2307_v2  ;;  %v2391_v2 = vld [vmem:[#allocation6 + $0x14] ss:$24 sps:$4 sm:$0xff]  }
  0x7c   :  { %899 = vmatprep.subr.bf16.mxu0 %v2315_v3  ;;  %v2394_v3 = vld [vmem:[#allocation8 + $0x4] ss:$24 sps:$4 sm:$0xff]  }
  0x7f   :  { %900 = vmatpush2.bf16.msra.mxu0 %v2313_v4  ;;  %v2389_v4 = vld [vmem:[#allocation6 + $0x10] ss:$24 sps:$4 sm:$0xff]  }
  0x80   :  { %901 = vmatprep.subr.bf16.mxu0 %v2321_v5  ;;  %v2392_v5 = vld [vmem:[#allocation8] ss:$24 sps:$4 sm:$0xff]  }
  0x83   :  { %902 = vmatpush2.bf16.msra.mxu0 %v2319_v6  ;;  %v2397_v6 = vld [vmem:[#allocation6 + $0x2e4] ss:$24 sps:$4 sm:$0xff]  }
  0x84   :  { %903 = vmatprep.subr.bf16.mxu0 %v2327_v7  ;;  %v2400_v7 = vld [vmem:[#allocation8 + $0x2d4] ss:$24 sps:$4 sm:$0xff]  }
  0x87   :  { %904 = vmatpush2.bf16.msra.mxu0 %v2325_v8  ;;  %v2395_v8 = vld [vmem:[#allocation6 + $0x2e0] ss:$24 sps:$4 sm:$0xff]  }
  0x88   :  { %905 = vmatprep.subr.bf16.mxu0 %v2333_v9  ;;  %v2398_v9 = vld [vmem:[#allocation8 + $0x2d0] ss:$24 sps:$4 sm:$0xff]  }
  0x8b   :  { %906 = vmatpush2.bf16.msra.mxu0 %v2331_v10  ;;  %v2403_v10 = vld [vmem:[#allocation6 + $0x2b4] ss:$24 sps:$4 sm:$0xff]  }
  0x8c   :  { %907 = vmatprep.subr.bf16.mxu0 %v2339_v12  ;;  %v2401_v12 = vld [vmem:[#allocation6 + $0x2b0] ss:$24 sps:$4 sm:$0xff]  }
  0x8f   :  { %908 = vmatpush2.bf16.msra.mxu0 %v2337_v13  ;;  %v2404_v13 = vld [vmem:[#allocation8 + $0x2a0] ss:$24 sps:$4 sm:$0xff]  }
  0x90   :  { %909 = vmatprep.subr.bf16.mxu0 %v2345_v16  ;;  %v2407_v16 = vld [vmem:[#allocation6 + $0x280] ss:$24 sps:$4 sm:$0xff]  }
  0x93   :  { %910 = vmatpush2.bf16.msra.mxu0 %v2343_v17  ;;  %v2410_v17 = vld [vmem:[#allocation8 + $0x270] ss:$24 sps:$4 sm:$0xff]  }
  0x94   :  { %1539 = vmatprep.subr.bf16.mxu0 %v2352_v20  ;;  %v2413_v20 = vld [vmem:[#allocation6 + $0x250] ss:$24 sps:$4 sm:$0xff]  }
 0x116   :  { %v251_v28 = vpop.f32.mrf.mxu0 }
 0x117   :  { %v252_v29 = vadd.f32 %v251_v28, %v130_v26  ;;  %v2424_v26 = vld [vmem:[#allocation8 + $0x214] ss:$24 sps:$4 sm:$0xff]   ;;  %v2422_v28 = vld [vmem:[#allocation8 + $0x210] ss:$24 sps:$4 sm:$0xff]  }
 0x118   :  { %v253_v30 = vpop.f32.mrf.mxu0 }
 0x119   :  { %v254_v31 = vadd.f32 %v253_v30, %v134_v27  ;;  %v258_v32 = vmax.f32 %v252_v29, 0.0  ;;  %v2419_v27 = vld [vmem:[#allocation6 + $0x220] ss:$24 sps:$4 sm:$0xff]   ;;  %v2427_v29 = vld [vmem:[#allocation6 + $0x1f4] ss:$24 sps:$4 sm:$0xff]  }
 0x11a   :  { %v255_v33 = vpop.f32.mrf.mxu0  ;;  %v2430_v30 = vld [vmem:[#allocation8 + $0x1e4] ss:$24 sps:$4 sm:$0xff]  }
 0x11b   :  { %v259_v34 = vmax.f32 %v254_v31, 0.0  ;;  %v2799_v40 = vpack.c.bf16 %v258_v32, %v258_v32  ;;  %v2425_v31 = vld [vmem:[#allocation6 + $0x1f0] ss:$24 sps:$4 sm:$0xff]   ;;  %v2428_v32 = vld [vmem:[#allocation8 + $0x1e0] ss:$24 sps:$4 sm:$0xff]  }
 0x11c   :  { %v256_v35 = vpop.f32.mrf.mxu0  ;;  %v2433_v33 = vld [vmem:[#allocation6 + $0x1c4] ss:$24 sps:$4 sm:$0xff]  }
 0x11d   :  { %v261_v37 = vpack.c.bf16 %v259_v34, %v259_v34  ;;  %v2436_v34 = vld [vmem:[#allocation8 + $0x1b4] ss:$24 sps:$4 sm:$0xff]   ;;  %v2431_v35 = vld [vmem:[#allocation6 + $0x1c0] ss:$24 sps:$4 sm:$0xff]  }
 0x11f   :  { %870 = vmatprep.mubr.bf16.mxu1 %v261_v37  ;;  %911 = vmatprep.mubr.bf16.mxu0 %v261_v37 }
 0x120   :  { %871 = vmatmul.mubr.bf16.vlgmr.msra.gmra.mxu1 %v2799_v40  ;;  %912 = vmatmul.mubr.bf16.vlgmr.msra.gmra.mxu0 %v2799_v40 }
 0x121   :  { %921 = vmatpush1.bf16.msra.mxu1 %v2347_v38  ;;  %1540 = vmatpush1.bf16.msra.mxu0 %v2350_v39  ;;  %v2439_v38 = vld [vmem:[#allocation6 + $0x194] ss:$24 sps:$4 sm:$0xff]   ;;  %v2442_v39 = vld [vmem:[#allocation8 + $0x184] ss:$24 sps:$4 sm:$0xff]  }
 0x122   :  { %952 = vmatprep.mubr.bf16.mxu1 %v261_v37  ;;  %922 = vmatprep.subr.bf16.mxu1 %v2355_v41  ;;  %v2434_v37 = vld [vmem:[#allocation8 + $0x1b0] ss:$24 sps:$4 sm:$0xff]  }
 0x123   :  { %1541 = vmatprep.subr.bf16.mxu0 %v2358_v42  ;;  %1571 = vmatprep.mubr.bf16.mxu0 %v2803_v43  ;;  %v2437_v41 = vld [vmem:[#allocation6 + $0x190] ss:$24 sps:$4 sm:$0xff]   ;;  %v2440_v42 = vld [vmem:[#allocation8 + $0x180] ss:$24 sps:$4 sm:$0xff]  }
 0x125   :  { %923 = vmatpush1.bf16.msra.mxu1 %v2353_v44  ;;  %1542 = vmatpush1.bf16.msra.mxu0 %v2356_v45  ;;  %v2811_v44 = vld [vmem:[%s2861_s1] sm:$0xff]  ;;  %v2445_v45 = vld [vmem:[#allocation8 + $0x15c] ss:$24 sps:$4 sm:$0xff]  }
 0x126   :  { %924 = vmatprep.subr.bf16.mxu1 %v2361_v46  ;;  %1543 = vmatprep.subr.bf16.mxu0 %v2364_v47  ;;  %v2448_v46 = vld [vmem:[#allocation8 + $0x164] ss:$24 sps:$4 sm:$0xff]   ;;  %v2815_v47 = vpack.c.bf16 %v2811_v44, %v2811_v44 }
 0x129   :  { %925 = vmatpush1.bf16.msra.mxu1 %v2359_v48  ;;  %1544 = vmatpush1.bf16.msra.mxu0 %v2362_v49  ;;  %v2443_v48 = vld [vmem:[#allocation8 + $0x158] ss:$24 sps:$4 sm:$0xff]  }
 0x12a   :  { %926 = vmatprep.subr.bf16.mxu1 %v2367_v50  ;;  %1545 = vmatprep.subr.bf16.mxu0 %v2370_v51  ;;  %v2446_v49 = vld [vmem:[#allocation8 + $0x160] ss:$24 sps:$4 sm:$0xff]   ;;  %v2451_v50 = vld [vmem:[#allocation8 + $0x12c] ss:$24 sps:$4 sm:$0xff]  }
 0x12b   :  { %v2454_v51 = vld [vmem:[#allocation8 + $0x134] ss:$24 sps:$4 sm:$0xff]  }
 0x12d   :  { %927 = vmatpush1.bf16.msra.mxu1 %v2365_v52  ;;  %1546 = vmatpush1.bf16.msra.mxu0 %v2368_v53  ;;  %v2449_v52 = vld [vmem:[#allocation8 + $0x128] ss:$24 sps:$4 sm:$0xff]  }
 0x12e   :  { %928 = vmatprep.subr.bf16.mxu1 %v2373_v54  ;;  %1547 = vmatprep.subr.bf16.mxu0 %v2376_v55  ;;  %v2452_v53 = vld [vmem:[#allocation8 + $0x130] ss:$24 sps:$4 sm:$0xff]   ;;  %v2457_v54 = vld [vmem:[#allocation8 + $0xfc] ss:$24 sps:$4 sm:$0xff]  }
 0x12f   :  { %v2460_v55 = vld [vmem:[#allocation8 + $0x104] ss:$24 sps:$4 sm:$0xff]  }
 0x131   :  { %929 = vmatpush1.bf16.msra.mxu1 %v2371_v56  ;;  %1548 = vmatpush1.bf16.msra.mxu0 %v2374_v57  ;;  %v2455_v56 = vld [vmem:[#allocation8 + $0xf8] ss:$24 sps:$4 sm:$0xff]  }
 0x132   :  { %930 = vmatprep.subr.bf16.mxu1 %v2379_v58  ;;  %1549 = vmatprep.subr.bf16.mxu0 %v2382_v59  ;;  %v2458_v57 = vld [vmem:[#allocation8 + $0x100] ss:$24 sps:$4 sm:$0xff]   ;;  %v2466_v58 = vld [vmem:[#allocation8 + $0xd4] ss:$24 sps:$4 sm:$0xff]  }
 0x133   :  { %v2461_v59 = vld [vmem:[#allocation8 + $0xc8] ss:$24 sps:$4 sm:$0xff]  }
 0x135   :  { %931 = vmatpush1.bf16.msra.mxu1 %v2377_v60  ;;  %1550 = vmatpush1.bf16.msra.mxu0 %v2380_v61  ;;  %v2464_v60 = vld [vmem:[#allocation8 + $0xd0] ss:$24 sps:$4 sm:$0xff]   ;;  %v2469_v61 = vld [vmem:[#allocation8 + $0x9c] ss:$24 sps:$4 sm:$0xff]  }
 0x136   :  { %932 = vmatprep.subr.bf16.mxu1 %v2385_v62  ;;  %1551 = vmatprep.subr.bf16.mxu0 %v2388_v63  ;;  %v2472_v62 = vld [vmem:[#allocation8 + $0xa4] ss:$24 sps:$4 sm:$0xff]   ;;  %v2467_v63 = vld [vmem:[#allocation8 + $0x98] ss:$24 sps:$4 sm:$0xff]  }
 0x139   :  { %933 = vmatpush1.bf16.msra.mxu1 %v2383_v0  ;;  %1552 = vmatpush1.bf16.msra.mxu0 %v2386_v1  ;;  %v2475_v0 = vld [vmem:[#allocation8 + $0x6c] ss:$24 sps:$4 sm:$0xff]  }
 0x13a   :  { %934 = vmatprep.subr.bf16.mxu1 %v2391_v2  ;;  %1553 = vmatprep.subr.bf16.mxu0 %v2394_v3  ;;  %v2478_v1 = vld [vmem:[#allocation8 + $0x74] ss:$24 sps:$4 sm:$0xff]   ;;  %v2473_v2 = vld [vmem:[#allocation8 + $0x68] ss:$24 sps:$4 sm:$0xff]  }
 0x13b   :  { %v2476_v3 = vld [vmem:[#allocation8 + $0x70] ss:$24 sps:$4 sm:$0xff]  }
 0x13d   :  { %935 = vmatpush1.bf16.msra.mxu1 %v2389_v4  ;;  %1554 = vmatpush1.bf16.msra.mxu0 %v2392_v5  ;;  %v2481_v4 = vld [vmem:[#allocation8 + $0x3c] ss:$24 sps:$4 sm:$0xff]  }
 0x13e   :  { %936 = vmatprep.subr.bf16.mxu1 %v2397_v6  ;;  %1555 = vmatprep.subr.bf16.mxu0 %v2400_v7  ;;  %v2484_v5 = vld [vmem:[#allocation8 + $0x44] ss:$24 sps:$4 sm:$0xff]   ;;  %v2479_v6 = vld [vmem:[#allocation8 + $0x38] ss:$24 sps:$4 sm:$0xff]  }
 0x13f   :  { %v2482_v7 = vld [vmem:[#allocation8 + $0x40] ss:$24 sps:$4 sm:$0xff]  }
 0x141   :  { %937 = vmatpush2.bf16.msra.mxu1 %v2395_v8  ;;  %1556 = vmatpush2.bf16.msra.mxu0 %v2398_v9  ;;  %v2487_v8 = vld [vmem:[#allocation8 + $0xc] ss:$24 sps:$4 sm:$0xff]  }
 0x142   :  { %938 = vmatprep.subr.bf16.mxu1 %v2403_v10  ;;  %1557 = vmatprep.subr.bf16.mxu0 %v2406_v11  ;;  %v2490_v9 = vld [vmem:[#allocation8 + $0x14] ss:$24 sps:$4 sm:$0xff]   ;;  %v2485_v10 = vld [vmem:[#allocation8 + $0x8] ss:$24 sps:$4 sm:$0xff]  }
 0x143   :  { %v2488_v11 = vld [vmem:[#allocation8 + $0x10] ss:$24 sps:$4 sm:$0xff]  }
 0x145   :  { %939 = vmatpush2.bf16.msra.mxu1 %v2401_v12  ;;  %1558 = vmatpush2.bf16.msra.mxu0 %v2404_v13  ;;  %v2493_v12 = vld [vmem:[#allocation8 + $0x2dc] ss:$24 sps:$4 sm:$0xff]  }
 0x146   :  { %940 = vmatprep.subr.bf16.mxu1 %v2409_v14  ;;  %1559 = vmatprep.subr.bf16.mxu0 %v2412_v15  ;;  %v2496_v13 = vld [vmem:[#allocation8 + $0x2e4] ss:$24 sps:$4 sm:$0xff]   ;;  %v2491_v14 = vld [vmem:[#allocation8 + $0x2d8] ss:$24 sps:$4 sm:$0xff]  }
 0x147   :  { %v2494_v15 = vld [vmem:[#allocation8 + $0x2e0] ss:$24 sps:$4 sm:$0xff]  }
 0x149   :  { %941 = vmatpush2.bf16.msra.mxu1 %v2407_v16  ;;  %1560 = vmatpush2.bf16.msra.mxu0 %v2410_v17  ;;  %v2499_v16 = vld [vmem:[#allocation8 + $0x2ac] ss:$24 sps:$4 sm:$0xff]  }
 0x14a   :  { %942 = vmatprep.subr.bf16.mxu1 %v2415_v18  ;;  %1561 = vmatprep.subr.bf16.mxu0 %v2418_v19  ;;  %v2502_v17 = vld [vmem:[#allocation8 + $0x2b4] ss:$24 sps:$4 sm:$0xff]   ;;  %v2497_v18 = vld [vmem:[#allocation8 + $0x2a8] ss:$24 sps:$4 sm:$0xff]  }
 0x14b   :  { %v2500_v19 = vld [vmem:[#allocation8 + $0x2b0] ss:$24 sps:$4 sm:$0xff]  }
 0x14d   :  { %943 = vmatpush2.bf16.msra.mxu1 %v2413_v20  ;;  %1562 = vmatpush2.bf16.msra.mxu0 %v2416_v21  ;;  %v2505_v20 = vld [vmem:[#allocation8 + $0x27c] ss:$24 sps:$4 sm:$0xff]  }
 0x14e   :  { %944 = vmatprep.subr.bf16.mxu1 %v2421_v24  ;;  %1563 = vmatprep.subr.bf16.mxu0 %v2424_v26  ;;  %v2508_v21 = vld [vmem:[#allocation8 + $0x284] ss:$24 sps:$4 sm:$0xff]   ;;  %v2503_v24 = vld [vmem:[#allocation8 + $0x278] ss:$24 sps:$4 sm:$0xff]  }
 0x14f   :  { %v2506_v26 = vld [vmem:[#allocation8 + $0x280] ss:$24 sps:$4 sm:$0xff]  }
 0x151   :  { %945 = vmatpush2.bf16.msra.mxu1 %v2419_v27  ;;  %1564 = vmatpush2.bf16.msra.mxu0 %v2422_v28  ;;  %v2511_v27 = vld [vmem:[#allocation8 + $0x24c] ss:$24 sps:$4 sm:$0xff]  }
 0x152   :  { %946 = vmatprep.subr.bf16.mxu1 %v2427_v29  ;;  %1565 = vmatprep.subr.bf16.mxu0 %v2430_v30  ;;  %v2514_v28 = vld [vmem:[#allocation8 + $0x254] ss:$24 sps:$4 sm:$0xff]   ;;  %v2509_v29 = vld [vmem:[#allocation8 + $0x248] ss:$24 sps:$4 sm:$0xff]  }
 0x153   :  { %v2512_v30 = vld [vmem:[#allocation8 + $0x250] ss:$24 sps:$4 sm:$0xff]  }
 0x155   :  { %947 = vmatpush2.bf16.msra.mxu1 %v2425_v31  ;;  %1566 = vmatpush2.bf16.msra.mxu0 %v2428_v32  ;;  %v2517_v31 = vld [vmem:[#allocation8 + $0x21c] ss:$24 sps:$4 sm:$0xff]  }
 0x156   :  { %948 = vmatprep.subr.bf16.mxu1 %v2433_v33  ;;  %1567 = vmatprep.subr.bf16.mxu0 %v2436_v34  ;;  %v2520_v32 = vld [vmem:[#allocation8 + $0x224] ss:$24 sps:$4 sm:$0xff]   ;;  %v2515_v33 = vld [vmem:[#allocation8 + $0x218] ss:$24 sps:$4 sm:$0xff]  }
 0x157   :  { %v2518_v34 = vld [vmem:[#allocation8 + $0x220] ss:$24 sps:$4 sm:$0xff]  }
 0x159   :  { %949 = vmatpush2.bf16.msra.mxu1 %v2431_v35  ;;  %1568 = vmatpush2.bf16.msra.mxu0 %v2434_v37  ;;  %v2523_v35 = vld [vmem:[#allocation8 + $0x1ec] ss:$24 sps:$4 sm:$0xff]  }
 0x15a   :  { %950 = vmatprep.subr.bf16.mxu1 %v2439_v38  ;;  %1569 = vmatprep.subr.bf16.mxu0 %v2442_v39  ;;  %v2526_v37 = vld [vmem:[#allocation8 + $0x1f4] ss:$24 sps:$4 sm:$0xff]   ;;  %v2521_v38 = vld [vmem:[#allocation8 + $0x1e8] ss:$24 sps:$4 sm:$0xff]  }
 0x15b   :  { %v2524_v39 = vld [vmem:[#allocation8 + $0x1f0] ss:$24 sps:$4 sm:$0xff]  }
 0x15d   :  { %951 = vmatpush2.bf16.msra.mxu1 %v2437_v41  ;;  %1570 = vmatpush2.bf16.msra.mxu0 %v2440_v42  ;;  %v2529_v41 = vld [vmem:[#allocation8 + $0x1bc] ss:$24 sps:$4 sm:$0xff]  }
 0x15e   :  { %1580 = vmatprep.subr.bf16.mxu1 %v2445_v45  ;;  %1621 = vmatprep.subr.bf16.mxu0 %v2448_v46  ;;  %v2532_v42 = vld [vmem:[#allocation8 + $0x1c4] ss:$24 sps:$4 sm:$0xff]   ;;  %v2527_v45 = vld [vmem:[#allocation8 + $0x1b8] ss:$24 sps:$4 sm:$0xff]  }
 0x15f   :  { %v2530_v46 = vld [vmem:[#allocation8 + $0x1c0] ss:$24 sps:$4 sm:$0xff]  }
 0x160   :  { %953 = vmatmul.mubr.bf16.vlgmr.msra.gmra.mxu1 %v2799_v40  ;;  %1572 = vmatmul.mubr.bf16.vlgmr.msra.gmra.mxu0 %v2815_v47  ;;  %v2463_v40 = vld [vmem:[#allocation8 + $0xcc] ss:$24 sps:$4 sm:$0xff]  }
 0x161   :  { %1581 = vmatpush1.bf16.msra.mxu1 %v2443_v48  ;;  %1622 = vmatpush1.bf16.msra.mxu0 %v2446_v49  ;;  %v2535_v48 = vld [vmem:[#allocation8 + $0x18c] ss:$24 sps:$4 sm:$0xff]  }
 0x162   :  { %1582 = vmatprep.subr.bf16.mxu1 %v2451_v50  ;;  %1623 = vmatprep.subr.bf16.mxu0 %v2454_v51  ;;  %v2538_v49 = vld [vmem:[#allocation8 + $0x194] ss:$24 sps:$4 sm:$0xff]   ;;  %v2533_v50 = vld [vmem:[#allocation8 + $0x188] ss:$24 sps:$4 sm:$0xff]  }
 0x163   :  { %1612 = vmatprep.mubr.bf16.mxu1 %v2803_v43  ;;  %1653 = vmatprep.mubr.bf16.mxu0 %v2803_v43  ;;  %v2470_v43 = vld [vmem:[#allocation8 + $0xa0] ss:$24 sps:$4 sm:$0xff]   ;;  %v2536_v51 = vld [vmem:[#allocation8 + $0x190] ss:$24 sps:$4 sm:$0xff]  }
 0x165   :  { %1583 = vmatpush1.bf16.msra.mxu1 %v2449_v52  ;;  %1624 = vmatpush1.bf16.msra.mxu0 %v2452_v53 }
 0x166   :  { %1584 = vmatprep.subr.bf16.mxu1 %v2457_v54  ;;  %1625 = vmatprep.subr.bf16.mxu0 %v2460_v55 }
 0x169   :  { %1585 = vmatpush1.bf16.msra.mxu1 %v2455_v56  ;;  %1626 = vmatpush1.bf16.msra.mxu0 %v2458_v57 }
 0x16a   :  { %1586 = vmatprep.subr.bf16.mxu1 %v2463_v40  ;;  %1627 = vmatprep.subr.bf16.mxu0 %v2466_v58 }
 0x16d   :  { %1587 = vmatpush1.bf16.msra.mxu1 %v2461_v59  ;;  %1628 = vmatpush1.bf16.msra.mxu0 %v2464_v60  ;;  %v2539_v59 = vld [vmem:[#allocation9 + $0x78] sm:$0xff]  }
 0x16e   :  { %1588 = vmatprep.subr.bf16.mxu1 %v2469_v61  ;;  %1629 = vmatprep.subr.bf16.mxu0 %v2472_v62  ;;  %v2540_v60 = vld [vmem:[#allocation9 + $0x38] sm:$0xff]   ;;  %v2541_v61 = vld [vmem:[#allocation9 + $0x70] sm:$0xff]  }
 0x16f   :  { %v2542_v62 = vld [vmem:[#allocation9 + $0x30] sm:$0xff]  }
 0x171   :  { %1589 = vmatpush1.bf16.msra.mxu1 %v2467_v63  ;;  %1630 = vmatpush1.bf16.msra.mxu0 %v2470_v43  ;;  %v2543_v63 = vld [vmem:[#allocation9 + $0x68] sm:$0xff]   ;;  %v2545_v43 = vld [vmem:[#allocation9 + $0x60] sm:$0xff]  }
 0x172   :  { %1590 = vmatprep.subr.bf16.mxu1 %v2475_v0  ;;  %1631 = vmatprep.subr.bf16.mxu0 %v2478_v1  ;;  %v2546_v0 = vld [vmem:[#allocation9 + $0x20] sm:$0xff]   ;;  %v2547_v1 = vld [vmem:[#allocation9 + $0x58] sm:$0xff]  }
 0x175   :  { %1591 = vmatpush1.bf16.msra.mxu1 %v2473_v2  ;;  %1632 = vmatpush1.bf16.msra.mxu0 %v2476_v3  ;;  %v2548_v2 = vld [vmem:[#allocation9 + $0x18] sm:$0xff]   ;;  %v2549_v3 = vld [vmem:[#allocation9 + $0x50] sm:$0xff]  }
 0x176   :  { %1592 = vmatprep.subr.bf16.mxu1 %v2481_v4  ;;  %1633 = vmatprep.subr.bf16.mxu0 %v2484_v5  ;;  %v2550_v4 = vld [vmem:[#allocation9 + $0x10] sm:$0xff]   ;;  %v2551_v5 = vld [vmem:[#allocation9 + $0x48] sm:$0xff]  }
 0x179   :  { %1593 = vmatpush1.bf16.msra.mxu1 %v2479_v6  ;;  %1634 = vmatpush1.bf16.msra.mxu0 %v2482_v7  ;;  %v2552_v6 = vld [vmem:[#allocation9 + $0x8] sm:$0xff]   ;;  %v2553_v7 = vld [vmem:[#allocation9 + $0x40] sm:$0xff]  }
 0x17a   :  { %1594 = vmatprep.subr.bf16.mxu1 %v2487_v8  ;;  %1635 = vmatprep.subr.bf16.mxu0 %v2490_v9  ;;  %v2554_v8 = vld [vmem:[#allocation9] sm:$0xff]  }
 0x17d   :  { %1595 = vmatpush1.bf16.msra.mxu1 %v2485_v10  ;;  %1636 = vmatpush1.bf16.msra.mxu0 %v2488_v11 }
 0x17e   :  { %1596 = vmatprep.subr.bf16.mxu1 %v2493_v12  ;;  %1637 = vmatprep.subr.bf16.mxu0 %v2496_v13 }
 0x181   :  { %1597 = vmatpush2.bf16.msra.mxu1 %v2491_v14  ;;  %1638 = vmatpush2.bf16.msra.mxu0 %v2494_v15 }
 0x182   :  { %1598 = vmatprep.subr.bf16.mxu1 %v2499_v16  ;;  %1639 = vmatprep.subr.bf16.mxu0 %v2502_v17  ;;  %v1666_v17 = vld [vmem:[%s2866_s6] sm:$0xf] }
 0x185   :  { %1599 = vmatpush2.bf16.msra.mxu1 %v2497_v18  ;;  %1640 = vmatpush2.bf16.msra.mxu0 %v2500_v19  ;;  %v1671_v19 = vrot.slane %v1666_v17, %v2784_v23 }
 0x186   :  { %1600 = vmatprep.subr.bf16.mxu1 %v2505_v20  ;;  %1641 = vmatprep.subr.bf16.mxu0 %v2508_v21  ;;  %v1675_v21 = vrot.slane %v1666_v17, %v2790_v25 }
 0x189   :  { %1601 = vmatpush2.bf16.msra.mxu1 %v2503_v24  ;;  %1642 = vmatpush2.bf16.msra.mxu0 %v2506_v26 }
 0x18a   :  { %1602 = vmatprep.subr.bf16.mxu1 %v2511_v27  ;;  %1643 = vmatprep.subr.bf16.mxu0 %v2514_v28 }
 0x18d   :  { %1603 = vmatpush2.bf16.msra.mxu1 %v2509_v29  ;;  %1644 = vmatpush2.bf16.msra.mxu0 %v2512_v30 }
 0x18e   :  { %1604 = vmatprep.subr.bf16.mxu1 %v2517_v31  ;;  %1645 = vmatprep.subr.bf16.mxu0 %v2520_v32 }
 0x191   :  { %1605 = vmatpush2.bf16.msra.mxu1 %v2515_v33  ;;  %1646 = vmatpush2.bf16.msra.mxu0 %v2518_v34  ;;  %v1730_v33 = vld [vmem:[%s2868_s8] sm:$0x3] }
 0x192   :  { %1606 = vmatprep.subr.bf16.mxu1 %v2523_v35  ;;  %1647 = vmatprep.subr.bf16.mxu0 %v2526_v37  ;;  %v1716_v34 = vld [vmem:[%s2867_s7] sm:$0x3]  ;;  %v1678_v35 = vsub.s32 2, %v2781_v22  ;;  %v1735_v37 = vrot.slane %v1730_v33, %v2784_v23 }
 0x195   :  { %1607 = vmatpush2.bf16.msra.mxu1 %v2521_v38  ;;  %1648 = vmatpush2.bf16.msra.mxu0 %v2524_v39  ;;  %v1682_v38 = vsub.s32 3, %v2781_v22  ;;  %v1721_v39 = vrot.slane %v1716_v34, %v2784_v23 }
 0x196   :  { %1608 = vmatprep.subr.bf16.mxu1 %v2529_v41  ;;  %1649 = vmatprep.subr.bf16.mxu0 %v2532_v42  ;;  %v1679_v41 = vrot.slane %v1666_v17, %v1678_v35  ;;  %v1739_v42 = vrot.slane %v1730_v33, %v2790_v25 }
 0x199   :  { %1609 = vmatpush2.bf16.msra.mxu1 %v2527_v45  ;;  %1650 = vmatpush2.bf16.msra.mxu0 %v2530_v46  ;;  %v1725_v45 = vrot.slane %v1716_v34, %v2790_v25 }
 0x19a   :  { %1610 = vmatprep.subr.bf16.mxu1 %v2535_v48  ;;  %1651 = vmatprep.subr.bf16.mxu0 %v2538_v49 }
 0x19d   :  { %1611 = vmatpush2.bf16.msra.mxu1 %v2533_v50  ;;  %1652 = vmatpush2.bf16.msra.mxu0 %v2536_v51  ;;  %v1683_v51 = vrot.slane %v1666_v17, %v1682_v38 }
 0x19e   :  { %2193 = vmatprep.subr.bf16.mxu1 %v2539_v59 }
 0x1a0   :  { %1613 = vmatmul.mubr.bf16.vlgmr.msra.gmra.mxu1 %v2815_v47  ;;  %1654 = vmatmul.mubr.bf16.vlgmr.msra.gmra.mxu0 %v2815_v47  ;;  %v2544_v47 = vld [vmem:[#allocation9 + $0x28] sm:$0xff]  }
 0x1a1   :  { %2194 = vmatpush3.bf16.msra.mxu1 %v2540_v60 }
 0x1a2   :  { %2195 = vmatprep.subr.bf16.mxu1 %v2541_v61 }
 0x1a5   :  { %2196 = vmatpush3.bf16.msra.mxu1 %v2542_v62 }
 0x1a6   :  { %2197 = vmatprep.subr.bf16.mxu1 %v2543_v63 }
 0x1a9   :  { %2198 = vmatpush3.bf16.msra.mxu1 %v2544_v47 }
 0x1aa   :  { %2199 = vmatprep.subr.bf16.mxu1 %v2545_v43 }
 0x1ad   :  { %2200 = vmatpush3.bf16.msra.mxu1 %v2546_v0 }
 0x1ae   :  { %2201 = vmatprep.subr.bf16.mxu1 %v2547_v1 }
 0x1b1   :  { %2202 = vmatpush3.bf16.msra.mxu1 %v2548_v2 }
 0x1b2   :  { %2203 = vmatprep.subr.bf16.mxu1 %v2549_v3 }
 0x1b5   :  { %2204 = vmatpush3.bf16.msra.mxu1 %v2550_v4 }
 0x1b6   :  { %2205 = vmatprep.subr.bf16.mxu1 %v2551_v5 }
 0x1b9   :  { %2206 = vmatpush3.bf16.msra.mxu1 %v2552_v6 }
 0x1ba   :  { %2207 = vmatprep.subr.bf16.mxu1 %v2553_v7 }
 0x1bd   :  { %2208 = vmatpush3.bf16.msra.mxu1 %v2554_v8 }
 0x1e0   :  { %v872_v52 = vpop.f32.mrf.mxu1  ;;  %v2823_v53 = vpop.f32.mrf.mxu0 }
 0x1e2   :  { %v874_v54 = vpop.f32.mrf.mxu1  ;;  %v2825_v55 = vpop.f32.mrf.mxu0 }
 0x1e4   :  { %v876_v56 = vpop.f32.mrf.mxu1  ;;  %v917_v57 = vpop.f32.mrf.mxu0 }
 0x1e6   :  { %v877_v40 = vpop.f32.mrf.mxu1  ;;  %v918_v58 = vpop.f32.mrf.mxu0 }
 0x220   :  { %v954_v9 = vpop.f32.mrf.mxu1  ;;  %v1573_v10 = vpop.f32.mrf.mxu0 }
 0x221   :  { %v1662_v18 = vadd.f32 %v1573_v10, %v872_v52 }
 0x222   :  { %v956_v11 = vpop.f32.mrf.mxu1  ;;  %v1575_v12 = vpop.f32.mrf.mxu0 }
 0x223   :  { %v1663_v20 = vadd.f32 %v1575_v12, %v874_v54  ;;  %v1688_v24 = vadd.f32 %v1671_v19, %v1662_v18  ;;  %v1728_v54 = vadd.f32 %v1721_v39, %v954_v9  ;;  %v1729_v60 = vadd.f32 %v1725_v45, %v956_v11 }
 0x224   :  { %v958_v13 = vpop.f32.mrf.mxu1  ;;  %v1577_v14 = vpop.f32.mrf.mxu0 }
 0x225   :  { %v1689_v26 = vadd.f32 %v1675_v21, %v1663_v20  ;;  %v2172_v27 = vmul.f32 -1.442695, %v1688_v24 }
 0x226   :  { %v959_v15 = vpop.f32.mrf.mxu1  ;;  %v1578_v16 = vpop.f32.mrf.mxu0 }
 0x227   :  { %v2173_v28 = vmul.f32 -1.442695, %v1689_v26  ;;  %2555 = vpow2.f32 %v2172_v27 }
 0x229   :  { %2557 = vpow2.f32 %v2173_v28 }
 0x234   :  { %v2556_v29 = vpop.eup %2555 }
 0x235   :  { %v1704_v31 = vadd.f32 1.0, %v2556_v29 }
 0x236   :  { %v2558_v30 = vpop.eup %2557 }
 0x237   :  { %v1705_v32 = vadd.f32 1.0, %v2558_v30  ;;  %2559 = vrcp.f32 %v1704_v31 }
 0x239   :  { %2561 = vrcp.f32 %v1705_v32 }
 0x244   :  { %v2560_v52 = vpop.eup %2559 }
 0x246   :  { %v2562_v59 = vpop.eup %2561 }
 0x260   :  { %v1614_v46 = vpop.f32.mrf.mxu1  ;;  %v1655_v48 = vpop.f32.mrf.mxu0 }
 0x261   :  { %v1664_v49 = vadd.f32 %v1614_v46, %v2823_v53  ;;  %v1742_v50 = vadd.f32 %v1735_v37, %v1655_v48 }
 0x262   :  { %v1616_v56 = vpop.f32.mrf.mxu1  ;;  %v1657_v57 = vpop.f32.mrf.mxu0 }
 0x263   :  { %v1690_v40 = vadd.f32 %v1679_v41, %v1664_v49  ;;  %v1744_v58 = vmul.f32 %v2560_v52, %v1742_v50  ;;  %v1665_v22 = vadd.f32 %v1616_v56, %v2825_v55  ;;  %v1743_v23 = vadd.f32 %v1739_v42, %v1657_v57 }
 0x264   :  { %v1618_v61 = vpop.f32.mrf.mxu1  ;;  %v1659_v62 = vpop.f32.mrf.mxu0 }
 0x265   :  { %v2174_v25 = vmul.f32 -1.442695, %v1690_v40  ;;  %v1746_v63 = vadd.f32 %v1744_v58, %v1728_v54  ;;  %v1691_v47 = vadd.f32 %v1683_v51, %v1665_v22  ;;  %v1745_v43 = vmul.f32 %v2562_v59, %v1743_v23 }
 0x266   :  { %v1619_v53 = vpop.f32.mrf.mxu1  ;;  %v1660_v0 = vpop.f32.mrf.mxu0 }
 0x267   :  { %2563 = vpow2.f32 %v2174_v25  ;;  %v2175_v1 = vmul.f32 -1.442695, %v1691_v47  ;;  %v1747_v2 = vadd.f32 %v1745_v43, %v1729_v60 }
 0x269   :  { %2565 = vpow2.f32 %v2175_v1 }
 0x274   :  { %v2564_v3 = vpop.eup %2563 }
 0x275   :  { %v1706_v4 = vadd.f32 1.0, %v2564_v3 }
 0x276   :  { %v2566_v5 = vpop.eup %2565 }
 0x277   :  { %2567 = vrcp.f32 %v1706_v4  ;;  %v1707_v55 = vadd.f32 1.0, %v2566_v5 }
 0x278   :  { %2569 = vtanh.f32 %v1746_v63 }
 0x279   :  { %2571 = vrcp.f32 %v1707_v55 }
 0x27a   :  { %2573 = vtanh.f32 %v1747_v2 }
 0x284   :  { %v2568_v6 = vpop.eup %2567 }
 0x285   :  { %v2570_v7 = vpop.eup %2569  ;;  %v1750_v8 = vsub.f32 1.0, %v2568_v6  ;;  %v1754_v12 = vmul.f32 %v2568_v6, %v2811_v44  ;;  %v2176_v44 = vld [vmem:[%s2870_s10] ss:$0 sm:$0xff] }
 0x286   :  { %v2572_v9 = vpop.eup %2571 }
 0x287   :  { %v1751_v10 = vsub.f32 1.0, %v2572_v9  ;;  %v1752_v11 = vmul.f32 %v2570_v7, %v1750_v8  ;;  %v2574_v13 = vpop.eup %2573  ;;  %v1755_v15 = vmul.f32 %v2572_v9, %v2797_v36 }
 0x289   :  { %v1753_v14 = vmul.f32 %v2574_v13, %v1751_v10  ;;  %v1756_v16 = vadd.f32 %v1754_v12, %v1752_v11 }
 0x28b   :  { %v1757_v17 = vadd.f32 %v1755_v15, %v1753_v14  ;;  %1941 = vst [vmem:[%s2872_s12] sm:$0xff] %v1756_v16  ;;  %v1758_v19 = vpack.c.bf16 %v1756_v16, %v1756_v16 }
 0x28d   :  { %v1759_v18 = vpack.c.bf16 %v1757_v17, %v1757_v17  ;;  %1942 = vst [vmem:[%s2872_s12 + $0x8] sm:$0xff] %v1757_v17 }
 0x28f   :  { %1927 = vmatprep.mubr.bf16.mxu1 %v1759_v18 }
 0x290   :  { %1928 = vmatmul.mubr.bf16.vlgmr.msra.gmra.mxu1 %v1758_v19 }
 0x350   :  { %v2209_v20 = vpop.f32.mrf.mxu1 }
 0x352   :  { %v2210_v36 = vpop.f32.mrf.mxu1 }
 0x353   :  { %v2211_v21 = vadd.f32 %v2210_v36, %v2209_v20 }
 0x354   :  { %v2212_v24 = vpop.f32.mrf.mxu1 }
 0x355   :  { %v1930_v26 = vadd.f32 %v2211_v21, %v2176_v44 }
 0x356   :  { %v2213_v27 = vpop.f32.mrf.mxu1 }
 0x357   :  { %1935 = vst [vmem:[#allocation11] sm:$0xff] %v1930_v26 }
 0x358   :  { %2666 = shalt.err (!%p2663_p10)
}
 0x359   :  { %1952 = dma.vmem_to_hbm [thread:$0]  %s1950_s21, 128, %s2871_s11, [#allocation5]  }
 0x35a   :  { %2681 = dma.done.wait [#allocation5], 128  }
 0x35b   :  { %2682 = vsyncadd [#allocation5], 4294967168 }
 0x35c   :  { %1960 = vsyncpa [#allocation4], 1 }
 0x35d   :  { %1961 = vsyncpa [#allocation7], 1 }
 0x35e   :  { %1962 = vsyncpa [#allocation10], 1 }
 0x35f   :  { %1963 = vsyncpa [#allocation5], 1 }

</bundles_post_ra>
